<compile_context>
chip_gen: v7x
topology: tpu7x:2x2x1
jax: 0.10.0
libtpu: 0.0.40
codegen_flags: <defaults>
</compile_context>

<pallas_src>
import math
from functools import partial

import jax
import jax.numpy as jnp
from jax import lax
from jax.experimental import pallas as pl
from jax.experimental.pallas import tpu as pltpu


def _attention_kernel(num_heads, head_dim,
                      x_ref, mask_ref,
                      wqkv_ref, bqkv_ref,
                      wff_ref, bff_ref,
                      out_ref):
    H, hd = num_heads, head_dim
    Hhd = H * hd

    x = x_ref[0]                                    # (S, D)   f32
    m = mask_ref[0]                                 # (1, S)   f32

    # Fused Q/K/V projection: one wide MXU matmul (S, D) @ (D, 3*H*hd) + bias.
    qkv = jnp.dot(x, wqkv_ref[...], preferred_element_type=jnp.float32) + bqkv_ref[...]

    inv_sqrt_hd = 1.0 / math.sqrt(hd)
    neg_bias = 1000000.0 * (1.0 - m)                # (1, S), hoisted out of the head loop

    ctx_heads = []
    for h in range(H):                              # static unroll, all inside ONE grid step
        q = qkv[:, h * hd:(h + 1) * hd]                         # (S, hd)
        k = qkv[:, Hhd + h * hd:Hhd + (h + 1) * hd]             # (S, hd)
        v = qkv[:, 2 * Hhd + h * hd:2 * Hhd + (h + 1) * hd]     # (S, hd)

        # scores = q @ k^T folded into the MXU contraction (no explicit transpose).
        s = lax.dot_general(q, k, (((1,), (1,)), ((), ())),
                            preferred_element_type=jnp.float32)  # (S, S)
        s = s * inv_sqrt_hd - neg_bias               # additive -1e6 * (1 - mask)

        # Numerically-stable softmax over the key axis.
        s = s - jnp.max(s, axis=-1, keepdims=True)
        p = jnp.exp(s)
        denom = jnp.sum(p, axis=-1, keepdims=True)   # >= 1.0 after max subtraction
        r = pl.reciprocal(denom, approx=True)        # EUP vrcp
        r = r * (2.0 - denom * r)                    # one Newton step -> ~f32-exact
        attn = p * r

        ctx_heads.append(jnp.dot(attn, v, preferred_element_type=jnp.float32))  # (S, hd)

    ctx = jnp.concatenate(ctx_heads, axis=-1)        # (S, H*hd)  == combine_heads

    # Single output projection for all heads.
    out = jnp.dot(ctx, wff_ref[...], preferred_element_type=jnp.float32) + bff_ref[...]
    out_ref[0] = out


def attention_forward(x, mask, params, *, num_heads, head_dim):
    """x: (B, S, D) float32, mask: (B, S) float32. Returns (B, S, D) float32."""
    B, S, D = x.shape
    H, hd = num_heads, head_dim
    Hhd3 = 3 * H * hd

    # Fuse the three projection weights/biases into one slab (wrapper-side, traced once).
    wqkv = jnp.concatenate([params["wq"], params["wk"], params["wv"]], axis=1)  # (D, 3*H*hd)
    bqkv = jnp.concatenate([params["bq"], params["bk"], params["bv"]]).reshape(1, Hhd3)
    wff = params["wff"]                                                          # (H*hd, D)
    bff = params["bff"].reshape(1, D)
    mask3 = mask.reshape(B, 1, S).astype(jnp.float32)

    kernel = partial(_attention_kernel, H, hd)

    x_spec = pl.BlockSpec((1, S, D), lambda b: (b, 0, 0))
    mask_spec = pl.BlockSpec((1, 1, S), lambda b: (b, 0, 0))
    # Constant index_maps -> weights DMA'd once and stay VMEM-resident across the grid.
    wqkv_spec = pl.BlockSpec((D, Hhd3), lambda b: (0, 0))
    bqkv_spec = pl.BlockSpec((1, Hhd3), lambda b: (0, 0))
    wff_spec = pl.BlockSpec((H * hd, D), lambda b: (0, 0))
    bff_spec = pl.BlockSpec((1, D), lambda b: (0, 0))
    out_spec = pl.BlockSpec((1, S, D), lambda b: (b, 0, 0))

    return pl.pallas_call(
        kernel,
        out_shape=jax.ShapeDtypeStruct((B, S, D), jnp.float32),
        grid_spec=pltpu.PrefetchScalarGridSpec(
            num_scalar_prefetch=0,
            grid=(B,),
            in_specs=[x_spec, mask_spec, wqkv_spec, bqkv_spec, wff_spec, bff_spec],
            out_specs=out_spec,
        ),
        compiler_params=pltpu.CompilerParams(
            dimension_semantics=("parallel",)),   # batch splits across TCs on v7x
    )(x.astype(jnp.float32), mask3, wqkv, bqkv, wff, bff)


def attention_reference(x, mask, params, *, num_heads, head_dim):
    """Pure-JAX reference mirroring the PyTorch forward."""
    B, S, D = x.shape
    H, hd = num_heads, head_dim

    def split_heads(t):
        return t.reshape(B, S, H, hd).transpose(0, 2, 1, 3)      # (B, H, S, hd)

    Q = split_heads(x @ params["wq"] + params["bq"])
    K = split_heads(x @ params["wk"] + params["bk"])
    V = split_heads(x @ params["wv"] + params["bv"])

    dot = jnp.einsum("bhqd,bhkd->bhqk", Q, K) / math.sqrt(hd)
    dot = dot - 1000000.0 * (1.0 - mask[:, None, None, :])
    attn = jax.nn.softmax(dot, axis=-1)
    ctx = jnp.einsum("bhqk,bhkd->bhqd", attn, V)                  # (B, H, S, hd)
    ctx = ctx.transpose(0, 2, 1, 3).reshape(B, S, H * hd)         # combine_heads
    return ctx @ params["wff"] + params["bff"]


if __name__ == "__main__":
    # config: transformer_dim=32, num_heads=2, head_dim=16, attn_type='softmax',
    #         attention_dropout=0.0, attention_grad_checkpointing=False
    B, S, D = 2, 8, 32
    H, hd = 2, 16

    key = jax.random.PRNGKey(0)
    keys = jax.random.split(key, 10)
    scale = 1.0 / math.sqrt(D)
    params = {
        "wq": jax.random.uniform(keys[0], (D, H * hd), jnp.float32, -scale, scale),
        "bq": jax.random.uniform(keys[1], (H * hd,), jnp.float32, -scale, scale),
        "wk": jax.random.uniform(keys[2], (D, H * hd), jnp.float32, -scale, scale),
        "bk": jax.random.uniform(keys[3], (H * hd,), jnp.float32, -scale, scale),
        "wv": jax.random.uniform(keys[4], (D, H * hd), jnp.float32, -scale, scale),
        "bv": jax.random.uniform(keys[5], (H * hd,), jnp.float32, -scale, scale),
        "wff": jax.random.uniform(keys[6], (H * hd, D), jnp.float32, -scale, scale),
        "bff": jax.random.uniform(keys[7], (D,), jnp.float32, -scale, scale),
    }

    x = jax.random.normal(keys[8], (B, S, D), jnp.float32)
    # mask: first batch fully valid, second batch has last 3 positions padded.
    mask = jnp.ones((B, S), jnp.float32).at[1, -3:].set(0.0)

    out = attention_forward(x, mask, params, num_heads=H, head_dim=hd)
    out = jax.block_until_ready(out)

    ref = attention_reference(x, mask, params, num_heads=H, head_dim=hd)
    assert out.shape == (B, S, D)
    assert jnp.allclose(out, ref, rtol=1e-5, atol=1e-5), \
        f"max abs err {jnp.max(jnp.abs(out - ref))}"

    print("KERNEL_OK")
</pallas_src>

<mosaic_0001>
module attributes {stable_mosaic.version = 11 : i64} {
  func.func @_attention_kernel(%arg0: i32, %arg1: memref<1x8x32xf32, #tpu.memory_space<vmem>>, %arg2: memref<1x1x8xf32, #tpu.memory_space<vmem>>, %arg3: memref<32x96xf32, #tpu.memory_space<vmem>>, %arg4: memref<1x96xf32, #tpu.memory_space<vmem>>, %arg5: memref<32x32xf32, #tpu.memory_space<vmem>>, %arg6: memref<1x32xf32, #tpu.memory_space<vmem>>, %arg7: memref<1x8x32xf32, #tpu.memory_space<vmem>>) attributes {dimension_semantics = [#tpu.dimension_semantics<parallel>], iteration_bounds = array<i64: 2>, scalar_prefetch = 0 : i64, scratch_operands = 0 : i64, tpu.core_type = #tpu.core_type<tc>, window_params = [{transform_indices = @transform_0, window_bounds = array<i64: 1, 8, 32>}, {transform_indices = @transform_1, window_bounds = array<i64: 1, 1, 8>}, {pipeline_mode = #tpu.pipeline_mode<synchronous>, transform_indices = @transform_2, window_bounds = array<i64: 32, 96>}, {pipeline_mode = #tpu.pipeline_mode<synchronous>, transform_indices = @transform_3, window_bounds = array<i64: 1, 96>}, {pipeline_mode = #tpu.pipeline_mode<synchronous>, transform_indices = @transform_4, window_bounds = array<i64: 32, 32>}, {pipeline_mode = #tpu.pipeline_mode<synchronous>, transform_indices = @transform_5, window_bounds = array<i64: 1, 32>}, {transform_indices = @transform_6, window_bounds = array<i64: 1, 8, 32>}]} {
    %c0 = arith.constant 0 : index
    %c0_0 = arith.constant 0 : index
    %c0_1 = arith.constant 0 : index
    %0 = vector.load %arg1[%c0, %c0_0, %c0_1] : memref<1x8x32xf32, #tpu.memory_space<vmem>>, vector<1x8x32xf32>
    %1 = vector.shape_cast %0 : vector<1x8x32xf32> to vector<8x32xf32>
    %c0_2 = arith.constant 0 : index
    %c0_3 = arith.constant 0 : index
    %c0_4 = arith.constant 0 : index
    %2 = vector.load %arg2[%c0_2, %c0_3, %c0_4] : memref<1x1x8xf32, #tpu.memory_space<vmem>>, vector<1x1x8xf32>
    %3 = vector.shape_cast %2 : vector<1x1x8xf32> to vector<1x8xf32>
    %c0_5 = arith.constant 0 : index
    %c0_6 = arith.constant 0 : index
    %4 = vector.load %arg3[%c0_5, %c0_6] : memref<32x96xf32, #tpu.memory_space<vmem>>, vector<32x96xf32>
    %cst = arith.constant dense<0.000000e+00> : vector<8x96xf32>
    %5 = tpu.matmul %1, %4, %cst {dimension_numbers = #tpu.dot_dimension_numbers<[1], [0], [0], [1], [0, 0, 1, 1], [], []>} : vector<8x32xf32>, vector<32x96xf32>, vector<8x96xf32> -> vector<8x96xf32>
    %c0_7 = arith.constant 0 : index
    %c0_8 = arith.constant 0 : index
    %6 = vector.load %arg4[%c0_7, %c0_8] : memref<1x96xf32, #tpu.memory_space<vmem>>, vector<1x96xf32>
    %7 = vector.broadcast %6 : vector<1x96xf32> to vector<8x96xf32>
    %8 = arith.addf %5, %7 : vector<8x96xf32>
    %cst_9 = arith.constant 1.000000e+00 : f32
    %9 = vector.broadcast %cst_9 : f32 to vector<1x8xf32>
    %10 = arith.subf %9, %3 : vector<1x8xf32>
    %cst_10 = arith.constant 1.000000e+06 : f32
    %11 = vector.broadcast %cst_10 : f32 to vector<1x8xf32>
    %12 = arith.mulf %11, %10 : vector<1x8xf32>
    %13 = vector.extract_strided_slice %8 {offsets = [0, 0], sizes = [8, 16], strides = [1, 1]} : vector<8x96xf32> to vector<8x16xf32>
    %14 = vector.extract_strided_slice %8 {offsets = [0, 32], sizes = [8, 16], strides = [1, 1]} : vector<8x96xf32> to vector<8x16xf32>
    %15 = vector.extract_strided_slice %8 {offsets = [0, 64], sizes = [8, 16], strides = [1, 1]} : vector<8x96xf32> to vector<8x16xf32>
    %cst_11 = arith.constant dense<0.000000e+00> : vector<8x8xf32>
    %16 = tpu.matmul %13, %14, %cst_11 {dimension_numbers = #tpu.dot_dimension_numbers<[1], [1], [0], [0], [0, 0, 1, 0], [], []>} : vector<8x16xf32>, vector<8x16xf32>, vector<8x8xf32> -> vector<8x8xf32>
    %cst_12 = arith.constant 2.500000e-01 : f32
    %17 = vector.broadcast %cst_12 : f32 to vector<8x8xf32>
    %18 = arith.mulf %16, %17 : vector<8x8xf32>
    %19 = vector.broadcast %12 : vector<1x8xf32> to vector<8x8xf32>
    %20 = arith.subf %18, %19 : vector<8x8xf32>
    %cst_13 = arith.constant dense<0xFF800000> : vector<8xf32>
    %21 = vector.multi_reduction <maximumf>, %20, %cst_13 [1] : vector<8x8xf32> to vector<8xf32>
    %22 = vector.shape_cast %21 : vector<8xf32> to vector<8x1xf32>
    %23 = vector.broadcast %22 : vector<8x1xf32> to vector<8x8xf32>
    %24 = arith.subf %20, %23 : vector<8x8xf32>
    %25 = math.exp %24 : vector<8x8xf32>
    %cst_14 = arith.constant dense<0.000000e+00> : vector<8xf32>
    %26 = vector.multi_reduction <add>, %25, %cst_14 [1] : vector<8x8xf32> to vector<8xf32>
    %27 = vector.shape_cast %26 : vector<8xf32> to vector<8x1xf32>
    %28 = tpu.reciprocal %27 {approx = true} : vector<8x1xf32> -> vector<8x1xf32>
    %29 = arith.mulf %27, %28 : vector<8x1xf32>
    %cst_15 = arith.constant 2.000000e+00 : f32
    %30 = vector.broadcast %cst_15 : f32 to vector<8x1xf32>
    %31 = arith.subf %30, %29 : vector<8x1xf32>
    %32 = arith.mulf %28, %31 : vector<8x1xf32>
    %33 = vector.broadcast %32 : vector<8x1xf32> to vector<8x8xf32>
    %34 = arith.mulf %25, %33 : vector<8x8xf32>
    %cst_16 = arith.constant dense<0.000000e+00> : vector<8x16xf32>
    %35 = tpu.matmul %34, %15, %cst_16 {dimension_numbers = #tpu.dot_dimension_numbers<[1], [0], [0], [1], [0, 0, 1, 1], [], []>} : vector<8x8xf32>, vector<8x16xf32>, vector<8x16xf32> -> vector<8x16xf32>
    %36 = vector.extract_strided_slice %8 {offsets = [0, 16], sizes = [8, 16], strides = [1, 1]} : vector<8x96xf32> to vector<8x16xf32>
    %37 = vector.extract_strided_slice %8 {offsets = [0, 48], sizes = [8, 16], strides = [1, 1]} : vector<8x96xf32> to vector<8x16xf32>
    %38 = vector.extract_strided_slice %8 {offsets = [0, 80], sizes = [8, 16], strides = [1, 1]} : vector<8x96xf32> to vector<8x16xf32>
    %cst_17 = arith.constant dense<0.000000e+00> : vector<8x8xf32>
    %39 = tpu.matmul %36, %37, %cst_17 {dimension_numbers = #tpu.dot_dimension_numbers<[1], [1], [0], [0], [0, 0, 1, 0], [], []>} : vector<8x16xf32>, vector<8x16xf32>, vector<8x8xf32> -> vector<8x8xf32>
    %cst_18 = arith.constant 2.500000e-01 : f32
    %40 = vector.broadcast %cst_18 : f32 to vector<8x8xf32>
    %41 = arith.mulf %39, %40 : vector<8x8xf32>
    %42 = vector.broadcast %12 : vector<1x8xf32> to vector<8x8xf32>
    %43 = arith.subf %41, %42 : vector<8x8xf32>
    %cst_19 = arith.constant dense<0xFF800000> : vector<8xf32>
    %44 = vector.multi_reduction <maximumf>, %43, %cst_19 [1] : vector<8x8xf32> to vector<8xf32>
    %45 = vector.shape_cast %44 : vector<8xf32> to vector<8x1xf32>
    %46 = vector.broadcast %45 : vector<8x1xf32> to vector<8x8xf32>
    %47 = arith.subf %43, %46 : vector<8x8xf32>
    %48 = math.exp %47 : vector<8x8xf32>
    %cst_20 = arith.constant dense<0.000000e+00> : vector<8xf32>
    %49 = vector.multi_reduction <add>, %48, %cst_20 [1] : vector<8x8xf32> to vector<8xf32>
    %50 = vector.shape_cast %49 : vector<8xf32> to vector<8x1xf32>
    %51 = tpu.reciprocal %50 {approx = true} : vector<8x1xf32> -> vector<8x1xf32>
    %52 = arith.mulf %50, %51 : vector<8x1xf32>
    %cst_21 = arith.constant 2.000000e+00 : f32
    %53 = vector.broadcast %cst_21 : f32 to vector<8x1xf32>
    %54 = arith.subf %53, %52 : vector<8x1xf32>
    %55 = arith.mulf %51, %54 : vector<8x1xf32>
    %56 = vector.broadcast %55 : vector<8x1xf32> to vector<8x8xf32>
    %57 = arith.mulf %48, %56 : vector<8x8xf32>
    %cst_22 = arith.constant dense<0.000000e+00> : vector<8x16xf32>
    %58 = tpu.matmul %57, %38, %cst_22 {dimension_numbers = #tpu.dot_dimension_numbers<[1], [0], [0], [1], [0, 0, 1, 1], [], []>} : vector<8x8xf32>, vector<8x16xf32>, vector<8x16xf32> -> vector<8x16xf32>
    %59 = tpu.concatenate %35, %58 in 1 : vector<8x16xf32>, vector<8x16xf32> -> vector<8x32xf32>
    %c0_23 = arith.constant 0 : index
    %c0_24 = arith.constant 0 : index
    %60 = vector.load %arg5[%c0_23, %c0_24] : memref<32x32xf32, #tpu.memory_space<vmem>>, vector<32x32xf32>
    %cst_25 = arith.constant dense<0.000000e+00> : vector<8x32xf32>
    %61 = tpu.matmul %59, %60, %cst_25 {dimension_numbers = #tpu.dot_dimension_numbers<[1], [0], [0], [1], [0, 0, 1, 1], [], []>} : vector<8x32xf32>, vector<32x32xf32>, vector<8x32xf32> -> vector<8x32xf32>
    %c0_26 = arith.constant 0 : index
    %c0_27 = arith.constant 0 : index
    %62 = vector.load %arg6[%c0_26, %c0_27] : memref<1x32xf32, #tpu.memory_space<vmem>>, vector<1x32xf32>
    %63 = vector.broadcast %62 : vector<1x32xf32> to vector<8x32xf32>
    %64 = arith.addf %61, %63 : vector<8x32xf32>
    %c0_28 = arith.constant 0 : index
    %c0_29 = arith.constant 0 : index
    %c0_30 = arith.constant 0 : index
    %65 = vector.load %arg7[%c0_28, %c0_29, %c0_30] : memref<1x8x32xf32, #tpu.memory_space<vmem>>, vector<1x8x32xf32>
    %66 = vector.shape_cast %65 : vector<1x8x32xf32> to vector<8x32xf32>
    %67 = vector.shape_cast %64 : vector<8x32xf32> to vector<1x8x32xf32>
    tpu.vector_store %arg7[%c0_28, %c0_29, %c0_30], %67 {strides = array<i32>} : memref<1x8x32xf32, #tpu.memory_space<vmem>>, vector<1x8x32xf32>,
    return
  }
  func.func @transform_0(%arg0: i32) -> (i32, i32, i32) {
    %c0_i32 = arith.constant 0 : i32
    %c0_i32_0 = arith.constant 0 : i32
    %c0_i32_1 = arith.constant 0 : i32
    return %arg0, %c0_i32, %c0_i32_0 : i32, i32, i32
  }
  func.func @transform_1(%arg0: i32) -> (i32, i32, i32) {
    %c0_i32 = arith.constant 0 : i32
    %c0_i32_0 = arith.constant 0 : i32
    %c0_i32_1 = arith.constant 0 : i32
    return %arg0, %c0_i32, %c0_i32_0 : i32, i32, i32
  }
  func.func @transform_2(%arg0: i32) -> (i32, i32) {
    %c0_i32 = arith.constant 0 : i32
    %c0_i32_0 = arith.constant 0 : i32
    %c0_i32_1 = arith.constant 0 : i32
    return %c0_i32, %c0_i32_0 : i32, i32
  }
  func.func @transform_3(%arg0: i32) -> (i32, i32) {
    %c0_i32 = arith.constant 0 : i32
    %c0_i32_0 = arith.constant 0 : i32
    %c0_i32_1 = arith.constant 0 : i32
    return %c0_i32, %c0_i32_0 : i32, i32
  }
  func.func @transform_4(%arg0: i32) -> (i32, i32) {
    %c0_i32 = arith.constant 0 : i32
    %c0_i32_0 = arith.constant 0 : i32
    %c0_i32_1 = arith.constant 0 : i32
    return %c0_i32, %c0_i32_0 : i32, i32
  }
  func.func @transform_5(%arg0: i32) -> (i32, i32) {
    %c0_i32 = arith.constant 0 : i32
    %c0_i32_0 = arith.constant 0 : i32
    %c0_i32_1 = arith.constant 0 : i32
    return %c0_i32, %c0_i32_0 : i32, i32
  }
  func.func @transform_6(%arg0: i32) -> (i32, i32, i32) {
    %c0_i32 = arith.constant 0 : i32
    %c0_i32_0 = arith.constant 0 : i32
    %c0_i32_1 = arith.constant 0 : i32
    return %arg0, %c0_i32, %c0_i32_0 : i32, i32, i32
  }
}

</mosaic_0001>

<bundles_post_ra>
// kernel: tpu_custom_call.1
= control target key start
LH: loop header
LB: loop body
LE: loop exit
PB: predicated region body
PF: predicated region fallthrough
CT: control target
= control target key end

     0   :  { %11 = vsyncpa [#allocation3], 0  ;;  %s1626_s0 = inlined_call_operand.hbm [shape: f32[2,8,32], index: 0, kind: input, shape index: {}]   ;;  %s1627_s1 = inlined_call_operand.vmem [shape: f32[2,1,8], index: 1, kind: input, shape index: {}]   ;;  %s1628_s2 = inlined_call_operand.hbm [shape: f32[32,96], index: 2, kind: input, shape index: {}]   ;;  %s1629_s3 = inlined_call_operand.vmem [shape: f32[1,96], index: 3, kind: input, shape index: {}]   ;;  %s1630_s4 = inlined_call_operand.hbm [shape: f32[32,32], index: 4, kind: input, shape index: {}]   ;;  %s1631_s5 = inlined_call_operand.vmem [shape: f32[1,32], index: 5, kind: input, shape index: {}]   ;;  %s1632_s6 = inlined_call_operand.hbm [shape: f32[2,8,32], index: 6, kind: output, shape index: {}]  }
   0x1   :  { %13 = vsyncpa [#allocation3 + $0x1], 0 }
   0x2   :  { %14 = vsyncpa [#allocation6], 0 }
   0x3   :  { %15 = vsyncpa [#allocation4], 0 }
   0x4   :  { %17 = vsyncpa [#allocation4 + $0x1], 0  ;;  %s1340_s21 = smov 0   ;;  %s1342_s22 = smov 0  }
   0x5   :  { %s1344_s23 = smov 0   ;;  %s1346_s24 = smov 0  }
   0x6 LB: > { %s1361_s25 = sadd.s32 4294967295, %s1288_s24   ;;  %s948_s26 = sadd.s32 4294967294, %s1288_s24   ;;  %s1288_s24 = sphi %s1346_s24, %s1652_s24   ;;  %s1284_s23 = sphi %s1344_s23, %s1651_s23   ;;  %s1280_s22 = sphi %s1342_s22, %s1650_s22   ;;  %s1276_s21 = sphi %s1340_s21, %s1649_s21  }
   0x7   : > { %p43_p0 = scmp.ne.s32.totalorder %s1280_s22, %s1276_s21  ;;  %p1633_p1 = scmp.eq.s32.totalorder %s1361_s25, 0 }
   0x8   : > { %p183_p3 = scmp.eq.s32.totalorder %s948_s26, 1  ;;  %p949_p5 = scmp.ge.s32.totalorder %s1288_s24, 1 }
   0x9   : > { %p1370_p4 = por %p1633_p1, %p43_p0  ;;  %p190_p7 = scmp.lt.s32.totalorder %s1288_s24, 3 }
   0xa   : > { %p1375_p6 = por %p183_p3, %p43_p0  ;;  %s1290_s30 = smov [#allocation5]  }
   0xb   : > { %s1636_s27 = scalar_select %p1370_p4, 1, 0 }
   0xc   : > { %s1637_s28 = scalar_select %p1375_p6, 1, 0 }
   0xd   : > { %p1380_p8 = pnand %p949_p5, %p190_p7  ;;  %s202_s7 = sshll.u32 %s1290_s30, 4  ;;  %s1384_s7 = int_to_ptr.vmem [resolvable:$true] %s202_s7 }
   0xe   : > { %s1291_s9 = smov [#allocation7]   ;;  %s1132_s13 = scalar_lea.hbm %s1628_s2, 512 }
   0xf   : > { %p1058_p9 = pneg %p1380_p8  ;;  %s218_s10 = sshll.u32 %s1291_s9, 4  ;;  %s1395_s10 = int_to_ptr.vmem [resolvable:$true] %s218_s10 }
  0x10   : > { %p1133_p12 = scmp.ne.s32.totalorder %s1628_s2, %s1132_s13  ;;  %p1139_p5 = scmp.lt.u32.totalorder %s1132_s13, %s1628_s2 }
  0x11   : > { %p1391_p11 = pnand %p1058_p9, %p1633_p1 }
  0x13   : > { %p1134_p13 = pneg %p1391_p11 }
  0x15   : > { %p1135_p0 = pnand %p1134_p13, %p1133_p12 }
  0x17   : > { %p1136_p3 = pneg %p1135_p0 }
  0x19   : > { %p1141_p7 = pnand %p1139_p5, %p1136_p3 }
  0x1b   : > { %1144 = shalt.err (!%p1141_p7)
}
  0x1c   : > { %s1145_s18 = scalar_lea.vmem %s1384_s7, 512  ;;  %p1153_p2 = scmp.lt.s32.totalorder %s1384_s7, %s1384_s7 }
  0x1d   : > { %p1146_p9 = scmp.ne.s32.totalorder %s1384_s7, %s1145_s18  ;;  %p1154_p12 = scmp.lt.s32.totalorder %s1145_s18, %s1145_s18 }
  0x1f   : > { %p1148_p10 = pnand %p1146_p9, %p1134_p13  ;;  %p1155_p0 = por %p1154_p12, %p1153_p2 }
  0x21   : > { %p1149_p1 = pneg %p1148_p10 }
  0x23   : > { %p1156_p6 = pnand %p1155_p0, %p1149_p1 }
  0x25   : > { %1159 = shalt.err (!%p1156_p6)
}
  0x26   : > { %s1292_s19 = smov 128   ;;  %s1293_s20 = smov 8  }
  0x27   : > { %1061 = dma.hbm_to_vmem [thread:$0]  (!%p1391_p11), %s1628_s2, 512, %s1384_s7, [#allocation6], %s1292_s19, %s1292_s19, %s1293_s20  }
  0x28   : > { %s1160_s12 = scalar_lea.hbm %s1630_s4, 512 }
  0x29   : > { %p1161_p2 = scmp.ne.s32.totalorder %s1630_s4, %s1160_s12  ;;  %p1167_p10 = scmp.lt.u32.totalorder %s1160_s12, %s1630_s4 }
  0x2b   : > { %p1163_p1 = pnand %p1161_p2, %p1134_p13 }
  0x2d   : > { %p1164_p6 = pneg %p1163_p1 }
  0x2f   : > { %p1169_p3 = pnand %p1167_p10, %p1164_p6 }
  0x31   : > { %1172 = shalt.err (!%p1169_p3)
}
  0x32   : > { %s1173_s7 = scalar_lea.vmem %s1395_s10, 512  ;;  %p1181_p12 = scmp.lt.s32.totalorder %s1395_s10, %s1395_s10 }
  0x33   : > { %p1174_p5 = scmp.ne.s32.totalorder %s1395_s10, %s1173_s7  ;;  %p1182_p0 = scmp.lt.s32.totalorder %s1173_s7, %s1173_s7 }
  0x35   : > { %p1176_p7 = pnand %p1174_p5, %p1134_p13  ;;  %p1183_p2 = por %p1182_p0, %p1181_p12 }
  0x37   : > { %p1177_p9 = pneg %p1176_p7 }
  0x39   : > { %p1184_p1 = pnand %p1183_p2, %p1177_p9 }
  0x3b   : > { %1187 = shalt.err (!%p1184_p1)
}
  0x3c   : > { %1064 = dma.hbm_to_vmem [thread:$0]  (!%p1391_p11), %s1630_s4, 512, %s1395_s10, [#allocation6], %s1292_s19, %s1292_s19, %s1293_s20  }
  0x3d   : > { %s1450_s26 = sadd.s32 1, %s1288_s24   ;;  %s30_s8 = sadd.s32 1, %s1284_s23 }
  0x3e   : > { %s27_s30 = ssub.s32 %s1288_s24, %s1450_s26  ;;  %p37_p13 = scmp.ne.s32.totalorder %s1284_s23, %s1280_s22 }
  0x3f   : > { %p28_p6 = scmp.eq.s32.totalorder %s27_s30, 0  ;;  %p38_p10 = scmp.eq.s32.totalorder %s1288_s24, 0 }
  0x40   : > { %p1640_p3 = scmp.eq.s32.totalorder %s1361_s25, 1  ;;  %p1075_p7 = scmp.lt.s32.totalorder %s1288_s24, 2 }
  0x41   : > { %s1466_s11 = scalar_select %p28_p6, %s1284_s23, %s30_s8  }
  0x42   : > { %p1460_p5 = por %p1640_p3, %p37_p13  ;;  %p39_p9 = por %p38_p10, %p37_p13 }
  0x43   : > { %s235_s12 = sand.u32 1, %s1284_s23   ;;  %s954_s10 = sshll.u32 %s1288_s24, 7 }
  0x44   : > { %s1641_s9 = scalar_select %p1460_p5, 1, 0 }
  0x45   : > { %s953_s13 = sshll.u32 %s235_s12, 3  ;;  %s1473_s14 = scalar_lea.hbm %s1626_s0, %s954_s10 }
  0x46   : > { %s239_s15 = scalar_lea.vmem [#allocation2], %s953_s13  ;;  %p1477_p11 = pnand %p1075_p7, %p39_p9 }
  0x47   : > { %s246_s16 = sshll.u32 %s239_s15, 4  ;;  %s236_s17 = scalar_lea.sflag [#allocation3], %s235_s12  ;;  %s1475_s16 = int_to_ptr.vmem [resolvable:$true] %s246_s16 }
  0x48   : > { %s1188_s18 = scalar_lea.hbm %s1473_s14, 128  ;;  %p1190_p0 = pneg %p1477_p11 }
  0x49   : > { %p1189_p12 = scmp.ne.s32.totalorder %s1473_s14, %s1188_s18  ;;  %s1193_s13 = scalar_lea.hbm %s1626_s0, 256 }
  0x4a   : > { %p1194_p13 = scmp.lt.u32.totalorder %s1473_s14, %s1626_s0  ;;  %p1195_p6 = scmp.lt.u32.totalorder %s1193_s13, %s1188_s18 }
  0x4b   : > { %p1191_p2 = pnand %p1190_p0, %p1189_p12  ;;  %p1197_p3 = scmp.lt.u32.totalorder %s1188_s18, %s1473_s14 }
  0x4c   : > { %p1196_p10 = por %p1195_p6, %p1194_p13 }
  0x4d   : > { %p1192_p1 = pneg %p1191_p2 }
  0x4e   : > { %p1198_p7 = por %p1197_p3, %p1196_p10 }
  0x50   : > { %p1199_p9 = pnand %p1198_p7, %p1192_p1 }
  0x52   : > { %1202 = shalt.err (!%p1199_p9)
}
  0x53   : > { %s1203_s12 = scalar_lea.vmem %s1475_s16, 128  ;;  %s1294_s20 = smov [#allocation2]  }
  0x54   : > { %p1204_p12 = scmp.ne.s32.totalorder %s1475_s16, %s1203_s12  ;;  %s1208_s15 = sshll.u32 %s1294_s20, 4  ;;  %s1209_s15 = int_to_ptr.vmem [resolvable:$false] %s1208_s15 }
  0x55   : > { %s1210_s8 = scalar_lea.vmem %s1209_s15, 256  ;;  %p1211_p4 = scmp.lt.s32.totalorder %s1475_s16, %s1209_s15 }
  0x56   : > { %p1206_p2 = pnand %p1204_p12, %p1190_p0  ;;  %p1212_p13 = scmp.lt.s32.totalorder %s1210_s8, %s1203_s12 }
  0x58   : > { %p1207_p5 = pneg %p1206_p2  ;;  %p1213_p6 = por %p1212_p13, %p1211_p4 }
  0x5a   : > { %p1214_p10 = pnand %p1213_p6, %p1207_p5 }
  0x5c   : > { %1217 = shalt.err (!%p1214_p10)
}
  0x5d   : > { %1068 = dma.hbm_to_vmem [thread:$0]  (!%p1477_p11), %s1473_s14, 128, %s1475_s16, %s236_s17  }
  0x5e   : > { %261 = sbr.rel (%p1380_p8) target bundleno = 2079 (0x81f), region = 44  ;;  %s1509_s18 = sand.u32 (!%p1380_p8), 1, %s1280_s22  }
  0x5f   : > { %s956_s30 = sshll.u32 (!%p1380_p8), %s1509_s18, 3  ;;  %s264_s13 = scalar_lea.sflag (!%p1380_p8), [#allocation3], %s1509_s18 }
  0x60   : > { %s267_s10 = scalar_lea.vmem (!%p1380_p8), [#allocation2], %s956_s30  ;;  %p1643_p4 = scmp.ne.s32.totalorder (!%p1380_p8), %s1636_s27, 0 }
  0x65   : > { %1263 = dma.done.wait (%p1643_p4), %s264_s13, 128  }
  0x66   : > { %1265 = vsyncadd (%p1643_p4), %s264_s13, 4294967168  ;;  %p1644_p5 = scmp.eq.s32.totalorder %s1361_s25, 0 }
  0x68   : > { %1267 = dma.done.wait (%p1644_p5), [#allocation6], 1024   ;;  %p1645_p8 = pmov %p1644_p5 }
  0x69   : > { %v1295_v0 = vmov 0.0|0.0   ;;  %vm1296_vm0 = vmmov 0   ;;  %v1297_v1 = vmov 0.0   ;;  %v312_v2 = vld [vmem:[#allocation5] sm:$0xff]  ;;  %v313_v3 = vld [vmem:[#allocation5 + $0x8] sm:$0xff]  ;;  %v314_v4 = vld [vmem:[#allocation5 + $0x10] sm:$0xff]  ;;  %v479_v15 = vlaneseq }
  0x6a   : > { %1269 = vsyncadd (%p1645_p8), [#allocation6], 4294966272  ;;  %1034 = vmatprep.subr.bf16.mxu0 %v1295_v0  ;;  %1000 = vmatprep.mubr.msk.f32.mxu0 %vm1296_vm0, %v1297_v1  ;;  %v1035_v5 = vpack.c.bf16 %v313_v3, %v312_v2  ;;  %v315_v6 = vld [vmem:[#allocation5 + $0x18] sm:$0xff]  ;;  %vm323_vm1 = vcmask 261120   ;;  %v960_v9 = vld [vmem:[%s1629_s3] ss:$0 sm:$0xff] }
  0x6b   : > { %1003 = vmatprep.subr.mxu1 %v1297_v1  ;;  %1005 = vmatprep.mubr.msk.f32.mxu1 %vm1296_vm0, %v1297_v1  ;;  %v1038_v7 = vpack.c.bf16 %v315_v6, %v314_v4  ;;  %v310_v8 = vld [vmem:[%s267_s10] sm:$0xff]  ;;  %s1298_s14 = smov 64   ;;  %s1299_s16 = smov 96   ;;  %vm402_vm2 = vcmask 130048   ;;  %v480_v18 = vshrl.u32 %v479_v15, 7  ;;  %vm485_vm3 = vcmask 64512  }
  0x6c   : > { %1036 = vmatpush3.bf16.msra.mxu0 %v1035_v5  ;;  %p307_p11 = scmp.lt.s32.totalorder %s1361_s25, 1  ;;  %s1300_s20 = smov 80   ;;  %v751_v59 = vld [vmem:[#allocation7] sm:$0xff]  ;;  %v752_v60 = vld [vmem:[#allocation7 + $0x8] sm:$0xff]  ;;  %v753_v61 = vld [vmem:[#allocation7 + $0x10] sm:$0xff] }
  0x6d   : > { %1037 = vmatprep.subr.bf16.mxu0 %v1295_v0  ;;  %v481_v20 = vsub.s32 0, %v480_v18  ;;  %s1301_s15 = smov 112   ;;  %s1302_s8 = smov 48   ;;  %v1041_v62 = vpack.c.bf16 %v752_v60, %v751_v59  ;;  %v754_v63 = vld [vmem:[#allocation7 + $0x18] sm:$0xff]  ;;  %v968_v6 = vld [vmem:[%s1631_s5] ss:$0 sm:$0xff] }
  0x6e   : > { %s308_s7 = scalar_select %p307_p11, %s1361_s25, 1 }
  0x6f   : > { %s1303_s13 = smov 16   ;;  %s971_s29 = sshll.u32 %s1361_s25, 7 }
  0x70   : > { %1039 = vmatpush3.bf16.msra.mxu0 %v1038_v7  ;;  %s309_s12 = scalar_lea.vmem %s1627_s1, %s308_s7  ;;  %s1581_s19 = scalar_lea.hbm %s1632_s6, %s971_s29 }
  0x71   : > { %1040 = vmatprep.subr.bf16.mxu0 %v1295_v0  ;;  %v311_v16 = vld [vmem:[%s309_s12] sm:$0x1]  ;;  %s837_s12 = scalar_lea.sflag [#allocation4], %s1509_s18  ;;  %p1646_p1 = scmp.ne.s32.totalorder %s1641_s9, 0 }
  0x72   : > { %v397_v17 = vsub.f32 1.0, %v311_v16 }
  0x73   : > { %1001 = vmatmul.mubr.msk.f32.vlgmr.msra.gmra.mrb[0].mxu0 %vm323_vm1, %v310_v8 }
  0x74   : > { %1031 = vmatprep.mubr.msk.f32.mxu0 %vm1296_vm0, %v1297_v1  ;;  %v398_v19 = vmul.f32 1000000.0, %v397_v17  ;;  %1042 = vmatpush3.bf16.msra.mxu0 %v1041_v62 }
  0x75   : > { %1043 = vmatprep.subr.bf16.mxu0 %v1295_v0 }
  0x76   : > { %v482_v21 = vrot.slane %v398_v19, %v481_v20 }
 0x146   : > { %v393_v10 = vpop.f32.mrb[0].mxu0 }
 0x147   : > { %v1537_v11 = vadd.f32 %v960_v9, %v393_v10  ;;  %v1002_v12 = vpop.f32.mrb[1].mxu0 }
 0x149   : > { %500 = vrot.lane.b32.xlu1 %v1537_v11, %s1298_s14  ;;  %400 = vrot.lane.b32.xlu0 %v1537_v11, %s1299_s16  ;;  %s306_s14 = scalar_lea.vmem [#allocation8], %s956_s30  ;;  %s1304_s30 = smov [#allocation8]  }
 0x14a   : > { %s850_s16 = sshll.u32 %s306_s14, 4  ;;  %s1583_s16 = int_to_ptr.vmem [resolvable:$true] %s850_s16 }
 0x14b   : > { %s1218_s25 = scalar_lea.vmem %s1583_s16, 128 }
 0x14c   : > { %p1219_p0 = scmp.ne.s32.totalorder %s1583_s16, %s1218_s25 }
 0x14e   : > { %p1220_p3 = pnand %p1219_p0, %p1646_p1 }
 0x150   : > { %p1221_p7 = pneg %p1220_p3 }
 0x1bb   : > { %v401_v13 = vpop.permute.xlu0 %400  ;;  %v501_v14 = vpop.permute.xlu1 %500 }
 0x1bc   : > { %1004 = vmatpush3.xpose.msk.msra.mxu1 %vm402_vm2, %v401_v13 }
 0x1bd   : > { %1008 = vmatprep.subr.mxu1 %v1297_v1 }
 0x1bf   : > { %1006 = vmatmul.mubr.msk.f32.vlgmr.msra.gmra.mrb[0].mxu1 %vm402_vm2, %v1537_v11 }
 0x1c0   : > { %1009 = vmatpush3.msra.mxu1 %v501_v14  ;;  %1010 = vmatprep.mubr.msk.f32.mxu1 %vm1296_vm0, %v1297_v1 }
 0x1c1   : > { %1013 = vmatprep.subr.mxu1 %v1297_v1 }
 0x292   : > { %v473_v22 = vpop.f32.mrb[0].mxu1 }
 0x293   : > { %v477_v23 = vmul.f32 0.25, %v473_v22  ;;  %v1007_v24 = vpop.f32.mrb[1].mxu1 }
 0x295   : > { %v484_v25 = vsub.f32 %v477_v23, %v482_v21 }
 0x297   : > { %v486_v26 = vsel %vm485_vm3, %v484_v25, -inf }
 0x298   : > { %487 = vmax.xlane.f32.xlu0 %v486_v26 }
 0x325   : > { %v488_v27 = vpop.xlane.xlu0 %487 }
 0x326   : > { %v489_v28 = vsub.f32 %v484_v25, %v488_v27 }
 0x328   : > { %v490_v29 = vmul.f32 1.442695, %v489_v28 }
 0x32a   : > { %1124 = vpow2.f32 %v490_v29 }
 0x334   : > { %v1125_v30 = vpop.eup %1124 }
 0x335   : > { %v492_v31 = vsel %vm485_vm3, %v1125_v30, 0.0 }
 0x336   : > { %493 = vadd.xlane.f32.xlu1 %v492_v31 }
 0x347   : > { %578 = vrot.lane.b32.xlu1 %v1537_v11, %s1300_s20  ;;  %s1222_s20 = sshll.u32 %s1304_s30, 4  ;;  %s1223_s20 = int_to_ptr.vmem [resolvable:$false] %s1222_s20 }
 0x348   : > { %p1225_p9 = scmp.lt.s32.totalorder %s1583_s16, %s1223_s20 }
 0x34b   : > { %576 = vrot.lane.b32.xlu1 %v1537_v11, %s1301_s15  ;;  %s1224_s15 = scalar_lea.vmem %s1223_s20, 256 }
 0x34c   : > { %p1226_p12 = scmp.lt.s32.totalorder %s1224_s15, %s1218_s25 }
 0x34e   : > { %p1227_p2 = por %p1226_p12, %p1225_p9 }
 0x350   : > { %p1228_p13 = pnand %p1227_p2, %p1221_p7 }
 0x3c3   : > { %v494_v32 = vpop.xlane.xlu1 %493 }
 0x3c4   : > { %1126 = vrcp.f32 %v494_v32 }
 0x3c7   : > { %v579_v37 = vpop.permute.xlu1 %578 }
 0x3cb   : > { %v577_v39 = vpop.permute.xlu1 %576 }
 0x3ce   : > { %v1127_v33 = vpop.eup %1126 }
 0x3cf   : > { %v496_v34 = vmul.f32 %v1127_v33, %v494_v32 }
 0x3d1   : > { %v497_v35 = vsub.f32 2.0, %v496_v34 }
 0x3d3   : > { %v498_v36 = vmul.f32 %v1127_v33, %v497_v35 }
 0x3d5   : > { %v499_v38 = vmul.f32 %v1125_v30, %v498_v36 }
 0x3d7   : > { %1011 = vmatmul.mubr.msk.f32.vlgmr.msra.gmra.mrb[2].mxu1 %vm485_vm3, %v499_v38 }
 0x3d8   : > { %1014 = vmatpush3.xpose.msk.msra.mxu1 %vm402_vm2, %v579_v37  ;;  %1015 = vmatprep.mubr.msk.f32.mxu1 %vm1296_vm0, %v1297_v1 }
 0x3d9   : > { %1018 = vmatprep.subr.mxu1 %v1297_v1 }
 0x3db   : > { %1016 = vmatmul.mubr.msk.f32.vlgmr.msra.gmra.mrb[4].mxu1 %vm402_vm2, %v577_v39 }
 0x3dc   : > { %1020 = vmatprep.mubr.msk.f32.mxu1 %vm1296_vm0, %v1297_v1  ;;  %v1044_v1 = vpack.c.bf16 %v754_v63, %v753_v61 }
 0x3de   : > { %1045 = vmatpush3.bf16.msra.mxu0 %v1044_v1 }
 0x4aa   : > { %v572_v40 = vpop.f32.mrb[2].mxu1 }
 0x4ab   : > { %v1012_v41 = vpop.f32.mrb[3].mxu1 }
 0x4ae   : > { %v650_v42 = vpop.f32.mrb[4].mxu1 }
 0x4af   : > { %v654_v43 = vmul.f32 0.25, %v650_v42  ;;  %v1017_v44 = vpop.f32.mrb[5].mxu1 }
 0x4b1   : > { %v655_v45 = vsub.f32 %v654_v43, %v482_v21 }
 0x4b3   : > { %v656_v46 = vsel %vm485_vm3, %v655_v45, -inf }
 0x4b4   : > { %657 = vmax.xlane.f32.xlu1 %v656_v46 }
 0x541   : > { %v658_v47 = vpop.xlane.xlu1 %657 }
 0x542   : > { %v659_v48 = vsub.f32 %v655_v45, %v658_v47 }
 0x544   : > { %v660_v49 = vmul.f32 1.442695, %v659_v48 }
 0x546   : > { %1128 = vpow2.f32 %v660_v49 }
 0x550   : > { %v1129_v50 = vpop.eup %1128 }
 0x551   : > { %v662_v51 = vsel %vm485_vm3, %v1129_v50, 0.0 }
 0x552   : > { %663 = vadd.xlane.f32.xlu0 %v662_v51 }
 0x568   : > { %670 = vrot.lane.b32.xlu0 %v1537_v11, %s1302_s8 }
 0x5df   : > { %v664_v52 = vpop.xlane.xlu0 %663 }
 0x5e0   : > { %1130 = vrcp.f32 %v664_v52 }
 0x5e3   : > { %v671_v53 = vpop.permute.xlu0 %670 }
 0x5e4   : > { %1019 = vmatpush3.msra.mxu1 %v671_v53 }
 0x5ea   : > { %v1131_v54 = vpop.eup %1130 }
 0x5eb   : > { %v666_v55 = vmul.f32 %v1131_v54, %v664_v52 }
 0x5ed   : > { %v667_v56 = vsub.f32 2.0, %v666_v55 }
 0x5ef   : > { %v668_v57 = vmul.f32 %v1131_v54, %v667_v56 }
 0x5f1   : > { %v669_v58 = vmul.f32 %v1129_v50, %v668_v57 }
 0x5f3   : > { %1021 = vmatmul.mubr.msk.f32.vlgmr.msra.gmra.mrb[6].mxu1 %vm485_vm3, %v669_v58 }
 0x6c6   : > { %v742_v2 = vpop.f32.mrb[6].mxu1 }
 0x6c7   : > { %747 = vrot.lane.b32.xlu0 %v742_v2, %s1303_s13  ;;  %v1022_v3 = vpop.f32.mrb[7].mxu1 }
 0x739   : > { %v748_v4 = vpop.permute.xlu0 %747 }
 0x73a   : > { %v750_v5 = vsel %vm402_vm2, %v572_v40, %v748_v4 }
 0x73b   : > { %1032 = vmatmul.mubr.msk.f32.vlgmr.msra.gmra.mrb[2].mxu0 %vm323_vm1, %v750_v5 }
 0x80e   : > { %v831_v0 = vpop.f32.mrb[2].mxu0 }
 0x80f   : > { %v832_v7 = vadd.f32 %v968_v6, %v831_v0  ;;  %v1033_v8 = vpop.f32.mrb[3].mxu0 }
 0x811   : > { %835 = vst.msk [vmem:[%s306_s14] sm:$0xff] %vm323_vm1, %v832_v7 }
 0x812   : > { %1231 = shalt.err (!%p1228_p13)
}
 0x813   : > { %s1232_s18 = scalar_lea.hbm %s1581_s19, 128  ;;  %s1236_s10 = scalar_lea.hbm %s1632_s6, 256 }
 0x814   : > { %p1233_p6 = scmp.ne.s32.totalorder %s1581_s19, %s1232_s18  ;;  %p1237_p5 = scmp.lt.u32.totalorder %s1581_s19, %s1632_s6 }
 0x815   : > { %p1238_p8 = scmp.lt.u32.totalorder %s1236_s10, %s1232_s18  ;;  %p1240_p0 = scmp.lt.u32.totalorder %s1232_s18, %s1581_s19 }
 0x816   : > { %p1234_p10 = pnand %p1233_p6, %p1646_p1 }
 0x817   : > { %p1239_p11 = por %p1238_p8, %p1237_p5 }
 0x818   : > { %p1235_p4 = pneg %p1234_p10 }
 0x819   : > { %p1241_p3 = por %p1240_p0, %p1239_p11 }
 0x81b   : > { %p1242_p7 = pnand %p1241_p3, %p1235_p4 }
 0x81d   : > { %1245 = shalt.err (!%p1242_p7)
}
 0x81e   : > { %1056 = dma.vmem_to_hbm [thread:$0]  (%p1646_p1), %s1583_s16, 128, %s1581_s19, %s837_s12  }
 0x81f PF: > { %s862_s14 = sand.u32 1, %s1276_s21   ;;  %p1647_p9 = scmp.ne.s32.totalorder %s1637_s28, 0 }
 0x820   : > { %p1648_p12 = scmp.ge.s32.totalorder %s1288_s24, 2  ;;  %s863_s7 = scalar_lea.sflag [#allocation4], %s862_s14 }
 0x822   : > { %p1070_p2 = pnand %p1648_p12, %p1647_p9 }
 0x824   : > { %1271 = dma.done.wait (!%p1070_p2), %s863_s7, 128  }
 0x825   : > { %1273 = vsyncadd (!%p1070_p2), %s863_s7, 4294967168  ;;  %p20_p13 = scmp.ge.s32.totalorder %s1450_s26, 4   ;;  %s1649_s21 = smov %s1280_s22 }
 0x826   : > { %s1650_s22 = smov %s1284_s23  ;;  %s1651_s23 = smov %s1466_s11 }
 0x827   : > { %s1652_s24 = smov %s1450_s26  ;;  %22 = sbr.rel (!%p20_p13) target bundleno = 6 (0x6), region = 100 }
 0x82e   :  { %868 = vsyncpa [#allocation3], 1 }
 0x82f   :  { %870 = vsyncpa [#allocation3 + $0x1], 1 }
 0x830   :  { %871 = vsyncpa [#allocation6], 1 }
 0x831   :  { %872 = vsyncpa [#allocation4], 1 }
 0x832   :  { %874 = vsyncpa [#allocation4 + $0x1], 1 }

</bundles_post_ra>
